<compile_context>
chip_gen: v7x
topology: tpu7x:2x2x1
jax: 0.10.0
libtpu: 0.0.40
codegen_flags: <defaults>
</compile_context>

<pallas_src>
import math
from functools import partial

import jax
import jax.numpy as jnp
from jax.experimental import pallas as pl
from jax.experimental.pallas import tpu as pltpu


def _self_attention_kernel(x_ref, wqkv_ref, bqkv_ref, o_ref, *,
                           b_blk, seq_len, embed_dim, scale):
    # x_ref: (b_blk*seq_len, D_in) rows for this grid step.
    rows, _ = x_ref.shape
    e = embed_dim
    s = seq_len

    # Fused QKV projection: one MXU matmul over all rows, f32 accumulation.
    qkv = jnp.dot(x_ref[...], wqkv_ref[...],
                  preferred_element_type=jnp.float32)
    qkv = qkv + bqkv_ref[...]                                   # (rows, 3E)

    # Slice Q/K/V; fold the 1/sqrt(E) scale into Q (cheaper than scaling scores).
    q = (qkv[:, 0 * e:1 * e] * scale).reshape(b_blk, s, e)
    k = qkv[:, 1 * e:2 * e].reshape(b_blk, s, e)
    v = qkv[:, 2 * e:3 * e].reshape(b_blk, s, e)

    # Attention scores without materializing K^T: (b_blk, S, S).
    scores = jnp.einsum('bqd,bkd->bqk', q, k,
                        preferred_element_type=jnp.float32)

    # Numerically stable softmax along the key axis (all math stays in f32).
    scores = scores - jnp.max(scores, axis=-1, keepdims=True)
    probs = jnp.exp(scores)
    denom = jnp.sum(probs, axis=-1, keepdims=True)              # (b_blk, S, 1)

    # P @ V first, normalize afterwards; reciprocal goes to the EUP slot.
    out = jnp.einsum('bqk,bkd->bqd', probs, v,
                     preferred_element_type=jnp.float32)        # (b_blk, S, E)
    out = out * pl.reciprocal(denom, approx=True)

    o_ref[...] = out.reshape(rows, e).astype(o_ref.dtype)


def _pick_batch_block(B, S, D_in, E, target_rows=256,
                      vmem_budget_bytes=16 * 1024 * 1024):
    """Largest divisor of B that fits a rough f32 working-set budget, is
    sublane-aligned when it actually splits the batch, and (preferably) gives
    >= target_rows rows per MXU matmul."""
    best = None
    for d in range(1, B + 1):
        if B % d != 0:
            continue
        rows = d * S
        # Only split the row axis on sublane-aligned tiles (full-extent is ok).
        if rows % 8 != 0 and d != B:
            continue
        # rough f32 working set: x tile, qkv (+copy), scores, out
        ws = 4 * (rows * D_in + 2 * rows * 3 * E + d * S * S + rows * E)
        if ws > vmem_budget_bytes and best is not None:
            break
        best = d
        if rows >= target_rows:
            break
    return best if best is not None else B


def self_attention_pallas(x, wq, wk, wv, bq, bk, bv):
    """x: (B, S, D_in); wq/wk/wv: (D_in, E); bq/bk/bv: (1, E) -> (B, S, E)."""
    B, S, D_in = x.shape
    E = wq.shape[1]

    # Fuse the three projections into a single weight / bias (one MXU matmul).
    w_qkv = jnp.concatenate([wq, wk, wv], axis=1)     # (D_in, 3E)
    b_qkv = jnp.concatenate([bq, bk, bv], axis=1)     # (1, 3E)

    b_blk = _pick_batch_block(B, S, D_in, E)
    n_blocks = B // b_blk
    rows_blk = b_blk * S

    # Wrapper-side layout plumbing: present the projection input as a 2-D slab.
    x2d = x.reshape(B * S, D_in)

    kernel = partial(_self_attention_kernel, b_blk=b_blk, seq_len=S,
                     embed_dim=E, scale=1.0 / math.sqrt(E))

    grid_spec = pltpu.PrefetchScalarGridSpec(
        num_scalar_prefetch=0,
        grid=(n_blocks,),
        in_specs=[
            pl.BlockSpec((rows_blk, D_in), lambda b: (b, 0)),   # x rows tile
            pl.BlockSpec((D_in, 3 * E), lambda b: (0, 0)),      # fused W_QKV
            pl.BlockSpec((1, 3 * E), lambda b: (0, 0)),         # fused b_QKV
        ],
        out_specs=pl.BlockSpec((rows_blk, E), lambda b: (b, 0)),
    )

    out2d = pl.pallas_call(
        kernel,
        out_shape=jax.ShapeDtypeStruct((B * S, E), x.dtype),
        grid_spec=grid_spec,
        compiler_params=pltpu.CompilerParams(
            dimension_semantics=("parallel",)),
    )(x2d, w_qkv, b_qkv)
    # TODO(synk): for long sequences (S >~ 1k) add a flash-style KV reduction
    # grid axis so the (S, S) scores tile never exceeds VMEM (mandatory on v7x).
    return out2d.reshape(B, S, E)


def self_attention_ref(x, wq, wk, wv, bq, bk, bv):
    q = x @ wq + bq
    k = x @ wk + bk
    v = x @ wv + bv
    scores = q @ jnp.swapaxes(k, -2, -1) / math.sqrt(q.shape[-1])
    probs = jax.nn.softmax(scores, axis=-1)
    return probs @ v


if __name__ == "__main__":
    # Small shapes consistent with the module: batch=2, seq=8, input_dim=32, embed_dim=32
    B, S, D_in, E = 2, 8, 32, 32

    key = jax.random.PRNGKey(0)
    kx, kq, kk, kv, kbq, kbk, kbv = jax.random.split(key, 7)

    x = jax.random.normal(kx, (B, S, D_in), dtype=jnp.float32)

    # nn.Linear default init: uniform(-1/sqrt(in_features), 1/sqrt(in_features)).
    bound = 1.0 / math.sqrt(D_in)
    # PyTorch stores W as (E, D_in); build the transposed (D_in, E) layout directly.
    wq = jax.random.uniform(kq, (D_in, E), jnp.float32, -bound, bound)
    wk = jax.random.uniform(kk, (D_in, E), jnp.float32, -bound, bound)
    wv = jax.random.uniform(kv, (D_in, E), jnp.float32, -bound, bound)
    bq = jax.random.uniform(kbq, (1, E), jnp.float32, -bound, bound)
    bk = jax.random.uniform(kbk, (1, E), jnp.float32, -bound, bound)
    bv = jax.random.uniform(kbv, (1, E), jnp.float32, -bound, bound)

    out = self_attention_pallas(x, wq, wk, wv, bq, bk, bv)
    out = jax.block_until_ready(out)

    ref = self_attention_ref(x, wq, wk, wv, bq, bk, bv)
    assert out.shape == (B, S, E)
    # approx reciprocal in softmax -> ~1e-3-level relative error tolerance.
    assert jnp.allclose(out, ref, atol=2e-3, rtol=2e-3), "mismatch vs reference"

    print("KERNEL_OK")
</pallas_src>

<mosaic_0001>
module attributes {stable_mosaic.version = 11 : i64} {
  func.func @_self_attention_kernel(%arg0: i32, %arg1: memref<16x32xf32, #tpu.memory_space<vmem>>, %arg2: memref<32x96xf32, #tpu.memory_space<vmem>>, %arg3: memref<1x96xf32, #tpu.memory_space<vmem>>, %arg4: memref<16x32xf32, #tpu.memory_space<vmem>>) attributes {dimension_semantics = [#tpu.dimension_semantics<parallel>], iteration_bounds = array<i64: 1>, scalar_prefetch = 0 : i64, scratch_operands = 0 : i64, tpu.core_type = #tpu.core_type<tc>, window_params = [{transform_indices = @transform_0, window_bounds = array<i64: 16, 32>}, {pipeline_mode = #tpu.pipeline_mode<synchronous>, transform_indices = @transform_1, window_bounds = array<i64: 32, 96>}, {pipeline_mode = #tpu.pipeline_mode<synchronous>, transform_indices = @transform_2, window_bounds = array<i64: 1, 96>}, {transform_indices = @transform_3, window_bounds = array<i64: 16, 32>}]} {
    %c0 = arith.constant 0 : index
    %c0_0 = arith.constant 0 : index
    %0 = vector.load %arg1[%c0, %c0_0] : memref<16x32xf32, #tpu.memory_space<vmem>>, vector<16x32xf32>
    %c0_1 = arith.constant 0 : index
    %c0_2 = arith.constant 0 : index
    %1 = vector.load %arg2[%c0_1, %c0_2] : memref<32x96xf32, #tpu.memory_space<vmem>>, vector<32x96xf32>
    %cst = arith.constant dense<0.000000e+00> : vector<16x96xf32>
    %2 = tpu.matmul %0, %1, %cst {dimension_numbers = #tpu.dot_dimension_numbers<[1], [0], [0], [1], [0, 0, 1, 1], [], []>} : vector<16x32xf32>, vector<32x96xf32>, vector<16x96xf32> -> vector<16x96xf32>
    %c0_3 = arith.constant 0 : index
    %c0_4 = arith.constant 0 : index
    %3 = vector.load %arg3[%c0_3, %c0_4] : memref<1x96xf32, #tpu.memory_space<vmem>>, vector<1x96xf32>
    %4 = vector.broadcast %3 : vector<1x96xf32> to vector<16x96xf32>
    %5 = arith.addf %2, %4 : vector<16x96xf32>
    %6 = vector.extract_strided_slice %5 {offsets = [0, 0], sizes = [16, 32], strides = [1, 1]} : vector<16x96xf32> to vector<16x32xf32>
    %cst_5 = arith.constant 0.176776692 : f32
    %7 = vector.broadcast %cst_5 : f32 to vector<16x32xf32>
    %8 = arith.mulf %6, %7 : vector<16x32xf32>
    %9 = vector.shape_cast %8 : vector<16x32xf32> to vector<2x8x32xf32>
    %10 = vector.extract_strided_slice %5 {offsets = [0, 32], sizes = [16, 32], strides = [1, 1]} : vector<16x96xf32> to vector<16x32xf32>
    %11 = vector.shape_cast %10 : vector<16x32xf32> to vector<2x8x32xf32>
    %12 = vector.extract_strided_slice %5 {offsets = [0, 64], sizes = [16, 32], strides = [1, 1]} : vector<16x96xf32> to vector<16x32xf32>
    %13 = vector.shape_cast %12 : vector<16x32xf32> to vector<2x8x32xf32>
    "tpu.trace_start"() <{level = 10 : i32, message = "bqd,bkd->bqk"}> : () -> ()
    %cst_6 = arith.constant dense<0.000000e+00> : vector<2x8x8xf32>
    %14 = tpu.matmul %9, %11, %cst_6 {dimension_numbers = #tpu.dot_dimension_numbers<[2], [2], [1], [1], [0, 0, 0, 1, 1, 1], [0], [0]>} : vector<2x8x32xf32>, vector<2x8x32xf32>, vector<2x8x8xf32> -> vector<2x8x8xf32>
    "tpu.trace_stop"() : () -> ()
    %cst_7 = arith.constant dense<0xFF800000> : vector<2x8xf32>
    %15 = vector.multi_reduction <maximumf>, %14, %cst_7 [2] : vector<2x8x8xf32> to vector<2x8xf32>
    %16 = vector.shape_cast %15 : vector<2x8xf32> to vector<2x8x1xf32>
    %17 = vector.broadcast %16 : vector<2x8x1xf32> to vector<2x8x8xf32>
    %18 = arith.subf %14, %17 : vector<2x8x8xf32>
    %19 = math.exp %18 : vector<2x8x8xf32>
    %cst_8 = arith.constant dense<0.000000e+00> : vector<2x8xf32>
    %20 = vector.multi_reduction <add>, %19, %cst_8 [2] : vector<2x8x8xf32> to vector<2x8xf32>
    %21 = vector.shape_cast %20 : vector<2x8xf32> to vector<2x8x1xf32>
    "tpu.trace_start"() <{level = 10 : i32, message = "bqk,bkd->bqd"}> : () -> ()
    %cst_9 = arith.constant dense<0.000000e+00> : vector<2x8x32xf32>
    %22 = tpu.matmul %19, %13, %cst_9 {dimension_numbers = #tpu.dot_dimension_numbers<[2], [1], [1], [2], [0, 0, 0, 1, 1, 2], [0], [0]>} : vector<2x8x8xf32>, vector<2x8x32xf32>, vector<2x8x32xf32> -> vector<2x8x32xf32>
    "tpu.trace_stop"() : () -> ()
    %23 = tpu.reciprocal %21 {approx = true} : vector<2x8x1xf32> -> vector<2x8x1xf32>
    %24 = vector.broadcast %23 : vector<2x8x1xf32> to vector<2x8x32xf32>
    %25 = arith.mulf %22, %24 : vector<2x8x32xf32>
    %26 = vector.shape_cast %25 : vector<2x8x32xf32> to vector<16x32xf32>
    %c0_10 = arith.constant 0 : index
    %c0_11 = arith.constant 0 : index
    %27 = vector.load %arg4[%c0_10, %c0_11] : memref<16x32xf32, #tpu.memory_space<vmem>>, vector<16x32xf32>
    tpu.vector_store %arg4[%c0_10, %c0_11], %26 {strides = array<i32>} : memref<16x32xf32, #tpu.memory_space<vmem>>, vector<16x32xf32>,
    return
  }
  func.func @transform_0(%arg0: i32) -> (i32, i32) {
    %c0_i32 = arith.constant 0 : i32
    %c0_i32_0 = arith.constant 0 : i32
    return %arg0, %c0_i32 : i32, i32
  }
  func.func @transform_1(%arg0: i32) -> (i32, i32) {
    %c0_i32 = arith.constant 0 : i32
    %c0_i32_0 = arith.constant 0 : i32
    %c0_i32_1 = arith.constant 0 : i32
    return %c0_i32, %c0_i32_0 : i32, i32
  }
  func.func @transform_2(%arg0: i32) -> (i32, i32) {
    %c0_i32 = arith.constant 0 : i32
    %c0_i32_0 = arith.constant 0 : i32
    %c0_i32_1 = arith.constant 0 : i32
    return %c0_i32, %c0_i32_0 : i32, i32
  }
  func.func @transform_3(%arg0: i32) -> (i32, i32) {
    %c0_i32 = arith.constant 0 : i32
    %c0_i32_0 = arith.constant 0 : i32
    return %arg0, %c0_i32 : i32, i32
  }
}

</mosaic_0001>

<bundles_post_ra>
// kernel: tpu_custom_call.1
= control target key start
LH: loop header
LB: loop body
LE: loop exit
PB: predicated region body
PF: predicated region fallthrough
CT: control target
= control target key end

     0   :  { %8 = vsyncpa [#allocation3], 0  ;;  %s737_s0 = inlined_call_operand.hbm [shape: f32[16,32], index: 0, kind: input, shape index: {}]   ;;  %s738_s1 = inlined_call_operand.hbm [shape: f32[32,96], index: 1, kind: input, shape index: {}]   ;;  %s739_s2 = inlined_call_operand.vmem [shape: f32[1,96], index: 2, kind: input, shape index: {}]   ;;  %s740_s3 = inlined_call_operand.hbm [shape: f32[16,32], index: 3, kind: output, shape index: {}]  }
   0x1   :  { %9 = vsyncpa [#allocation6], 0 }
   0x2   :  { %10 = vsyncpa [#allocation4], 0  ;;  %s642_s12 = smov [#allocation2]   ;;  %s570_s16 = scalar_lea.hbm %s737_s0, 256 }
   0x3   :  { %s16_s13 = sshll.u32 %s642_s12, 4  ;;  %p571_p0 = scmp.ne.s32.totalorder %s737_s0, %s570_s16  ;;  %s17_s13 = int_to_ptr.vmem [resolvable:$true] %s16_s13 }
   0x4   :  { %p574_p1 = scmp.lt.u32.totalorder %s570_s16, %s737_s0 }
   0x6   :  { %p576_p2 = pnand %p574_p1, %p571_p0 }
   0x8   :  { %579 = shalt.err (!%p576_p2)
}
   0x9   :  { %s580_s21 = scalar_lea.vmem %s17_s13, 256  ;;  %p585_p4 = scmp.lt.s32.totalorder %s17_s13, %s17_s13 }
   0xa   :  { %p581_p3 = scmp.ne.s32.totalorder %s17_s13, %s580_s21  ;;  %p586_p5 = scmp.lt.s32.totalorder %s580_s21, %s580_s21 }
   0xc   :  { %p587_p6 = por %p586_p5, %p585_p4 }
   0xe   :  { %p588_p7 = pnand %p587_p6, %p581_p3 }
  0x10   :  { %591 = shalt.err (!%p588_p7)
}
  0x11   :  { %s643_s22 = smov 128   ;;  %s644_s23 = smov 8  }
  0x12   :  { %22 = dma.hbm_to_vmem [thread:$0]  %s737_s0, 256, %s17_s13, [#allocation3], %s643_s22, %s643_s22, %s644_s23  }
  0x13   :  { %s645_s26 = smov [#allocation5]   ;;  %s592_s30 = scalar_lea.hbm %s738_s1, 512 }
  0x14   :  { %s28_s27 = sshll.u32 %s645_s26, 4  ;;  %p593_p8 = scmp.ne.s32.totalorder %s738_s1, %s592_s30  ;;  %s29_s27 = int_to_ptr.vmem [resolvable:$true] %s28_s27 }
  0x15   :  { %p596_p9 = scmp.lt.u32.totalorder %s592_s30, %s738_s1 }
  0x17   :  { %p598_p10 = pnand %p596_p9, %p593_p8 }
  0x19   :  { %601 = shalt.err (!%p598_p10)
}
  0x1a   :  { %s602_s8 = scalar_lea.vmem %s29_s27, 512  ;;  %p607_p12 = scmp.lt.s32.totalorder %s29_s27, %s29_s27 }
  0x1b   :  { %p603_p11 = scmp.ne.s32.totalorder %s29_s27, %s602_s8  ;;  %p608_p13 = scmp.lt.s32.totalorder %s602_s8, %s602_s8 }
  0x1d   :  { %p609_p0 = por %p608_p13, %p607_p12 }
  0x1f   :  { %p610_p1 = pnand %p609_p0, %p603_p11 }
  0x21   :  { %613 = shalt.err (!%p610_p1)
}
  0x22   :  { %34 = dma.hbm_to_vmem [thread:$0]  %s738_s1, 512, %s29_s27, [#allocation6], %s643_s22, %s643_s22, %s644_s23  }
  0x23   :  { %636 = dma.done.wait [#allocation3], 256  }
  0x24   :  { %637 = vsyncadd [#allocation3], 4294967040 }
  0x25   :  { %638 = dma.done.wait [#allocation6], 512  }
  0x26   :  { %639 = vsyncadd [#allocation6], 4294966784  ;;  %vm56_vm0 = vcmask 261120   ;;  %v45_v0 = vld [vmem:[#allocation5] sm:$0xff]  ;;  %v46_v1 = vld [vmem:[#allocation5 + $0x8] sm:$0xff]  ;;  %v646_v8 = vmov 0.0  }
  0x27   :  { %v47_v2 = vld [vmem:[#allocation5 + $0x10] sm:$0xff]  ;;  %v545_v3 = vpack.c.bf16 %v46_v1, %v45_v0  ;;  %v48_v4 = vld [vmem:[#allocation5 + $0x18] sm:$0xff]  ;;  %525 = vmatprep.subr.mxu1 %v646_v8  ;;  %vm647_vm1 = vmmov 0   ;;  %s648_s11 = smov 96   ;;  %s649_s12 = smov 64   ;;  %vm296_vm2 = vcmask 64512  }
  0x28   :  { %v43_v5 = vld [vmem:[#allocation2] sm:$0xff]  ;;  %v549_v6 = vpack.c.bf16 %v48_v4, %v47_v2  ;;  %v44_v7 = vld [vmem:[#allocation2 + $0x8] sm:$0xff]  ;;  %527 = vmatprep.mubr.msk.f32.mxu1 %vm647_vm1, %v646_v8 }
  0x29   :  { %522 = vmatprep.mubr.msk.f32.mxu0 %vm56_vm0, %v43_v5  ;;  %546 = vmatprep.subr.bf16.mxu0 %v545_v3  ;;  %v491_v9 = vld [vmem:[%s739_s2] ss:$0 sm:$0xff]  ;;  %s650_s2 = smov [#allocation7]  }
  0x2a   :  { %548 = vmatpush3.bf16.msra.mxu0 %v545_v3  ;;  %s478_s13 = sshll.u32 %s650_s2, 4  ;;  %s479_s13 = int_to_ptr.vmem [resolvable:$true] %s478_s13 }
  0x2b   :  { %550 = vmatprep.subr.bf16.mxu0 %v549_v6  ;;  %s614_s14 = scalar_lea.vmem %s479_s13, 256  ;;  %p619_p3 = scmp.lt.s32.totalorder %s479_s13, %s479_s13 }
  0x2c   :  { %p615_p2 = scmp.ne.s32.totalorder %s479_s13, %s614_s14  ;;  %p620_p4 = scmp.lt.s32.totalorder %s614_s14, %s614_s14 }
  0x2e   :  { %552 = vmatpush3.bf16.msra.mxu0 %v549_v6  ;;  %p621_p5 = por %p620_p4, %p619_p3 }
  0x2f   :  { %535 = vmatprep.subr.mxu0 %v646_v8 }
  0x30   :  { %p622_p6 = pnand %p621_p5, %p615_p2 }
  0x31   :  { %523 = vmatmul.mubr.msk.f32.vlgmr.msra.gmra.mrb[0].mxu0 %vm56_vm0, %v44_v7 }
  0x32   :  { %537 = vmatprep.mubr.msk.f32.mxu0 %vm647_vm1, %v646_v8 }
 0x104   :  { %v524_v10 = vpop.f32.mrb[0].mxu0 }
 0x105   :  { %v129_v11 = vpop.f32.mrb[1].mxu0  ;;  %v135_v13 = vadd.f32 %v524_v10, %v491_v9 }
 0x106   :  { %v130_v12 = vadd.f32 %v491_v9, %v129_v11 }
 0x107   :  { %v139_v17 = vmul.f32 0.17677669, %v135_v13 }
 0x108   :  { %141 = vrot.lane.b32.xlu0 %v130_v12, %s648_s11  ;;  %v138_v15 = vmul.f32 0.17677669, %v130_v12 }
 0x10c   :  { %219 = vrot.lane.b32.xlu0 %v135_v13, %s648_s11 }
 0x110   :  { %315 = vrot.lane.b32.xlu0 %v130_v12, %s649_s12 }
 0x17a   :  { %v142_v14 = vpop.permute.xlu0 %141 }
 0x17b   :  { %526 = vmatpush3.xpose.msk.msra.mxu1 %vm56_vm0, %v142_v14 }
 0x17c   :  { %530 = vmatprep.subr.mxu1 %v646_v8 }
 0x17e   :  { %v220_v16 = vpop.permute.xlu0 %219  ;;  %528 = vmatmul.mubr.msk.f32.vlgmr.msra.gmra.mrb[0].mxu1 %vm56_vm0, %v138_v15 }
 0x17f   :  { %531 = vmatpush3.xpose.msk.msra.mxu1 %vm56_vm0, %v220_v16  ;;  %532 = vmatprep.mubr.msk.f32.mxu1 %vm647_vm1, %v646_v8 }
 0x180   :  { %540 = vmatprep.subr.mxu1 %v646_v8 }
 0x182   :  { %v316_v18 = vpop.permute.xlu0 %315  ;;  %533 = vmatmul.mubr.msk.f32.vlgmr.msra.gmra.mrb[2].mxu1 %vm56_vm0, %v139_v17 }
 0x183   :  { %536 = vmatpush3.msra.mxu0 %v316_v18  ;;  %542 = vmatprep.mubr.msk.f32.mxu1 %vm647_vm1, %v646_v8 }
 0x251   :  { %v214_v19 = vpop.f32.mrb[0].mxu1 }
 0x252   :  { %v529_v20 = vpop.f32.mrb[1].mxu1  ;;  %v297_v21 = vsel %vm296_vm2, %v214_v19, -inf }
 0x253   :  { %298 = vmax.xlane.f32.xlu1 %v297_v21 }
 0x255   :  { %v292_v22 = vpop.f32.mrb[2].mxu1 }
 0x256   :  { %v534_v23 = vpop.f32.mrb[3].mxu1  ;;  %v300_v24 = vsel %vm296_vm2, %v292_v22, -inf }
 0x257   :  { %301 = vmax.xlane.f32.xlu1 %v300_v24 }
 0x268   :  { %391 = vrot.lane.b32.xlu1 %v135_v13, %s649_s12 }
 0x2e0   :  { %v299_v25 = vpop.xlane.xlu1 %298 }
 0x2e1   :  { %v303_v26 = vsub.f32 %v214_v19, %v299_v25 }
 0x2e3   :  { %v305_v27 = vmul.f32 1.442695, %v303_v26 }
 0x2e4   :  { %v302_v28 = vpop.xlane.xlu1 %301 }
 0x2e5   :  { %562 = vpow2.f32 %v305_v27  ;;  %v304_v29 = vsub.f32 %v292_v22, %v302_v28 }
 0x2e7   :  { %v307_v30 = vmul.f32 1.442695, %v304_v29 }
 0x2e8   :  { %v392_v31 = vpop.permute.xlu1 %391 }
 0x2e9   :  { %564 = vpow2.f32 %v307_v30  ;;  %541 = vmatpush3.msra.mxu1 %v392_v31 }
 0x2ef   :  { %v563_v32 = vpop.eup %562 }
 0x2f0   :  { %538 = vmatmul.mubr.msk.f32.vlgmr.msra.gmra.mrb[2].mxu0 %vm296_vm2, %v563_v32  ;;  %v309_v33 = vsel %vm296_vm2, %v563_v32, 0.0 }
 0x2f1   :  { %310 = vadd.xlane.f32.xlu0 %v309_v33 }
 0x2f3   :  { %v565_v34 = vpop.eup %564 }
 0x2f4   :  { %543 = vmatmul.mubr.msk.f32.vlgmr.msra.gmra.mrb[4].mxu1 %vm296_vm2, %v565_v34  ;;  %v312_v35 = vsel %vm296_vm2, %v565_v34, 0.0 }
 0x2f5   :  { %313 = vadd.xlane.f32.xlu1 %v312_v35 }
 0x37e   :  { %v311_v36 = vpop.xlane.xlu0 %310 }
 0x37f   :  { %566 = vrcp.f32 %v311_v36 }
 0x382   :  { %v314_v37 = vpop.xlane.xlu1 %313 }
 0x383   :  { %568 = vrcp.f32 %v314_v37 }
 0x389   :  { %v567_v38 = vpop.eup %566 }
 0x38d   :  { %v569_v42 = vpop.eup %568 }
 0x3c3   :  { %v387_v39 = vpop.f32.mrb[2].mxu0 }
 0x3c4   :  { %v469_v40 = vmul.f32 %v567_v38, %v387_v39  ;;  %v539_v41 = vpop.f32.mrb[3].mxu0 }
 0x3c6   :  { %471 = vst.msk [vmem:[#allocation7] sm:$0xff] %vm56_vm0, %v469_v40 }
 0x3c7   :  { %v463_v43 = vpop.f32.mrb[4].mxu1 }
 0x3c8   :  { %v470_v44 = vmul.f32 %v569_v42, %v463_v43  ;;  %v544_v45 = vpop.f32.mrb[5].mxu1 }
 0x3ca   :  { %472 = vst.msk [vmem:[#allocation7 + $0x8] sm:$0xff] %vm56_vm0, %v470_v44 }
 0x3cb   :  { %625 = shalt.err (!%p622_p6)
}
 0x3cc   :  { %s626_s17 = scalar_lea.hbm %s740_s3, 256 }
 0x3cd   :  { %p627_p7 = scmp.ne.s32.totalorder %s740_s3, %s626_s17  ;;  %p630_p8 = scmp.lt.u32.totalorder %s626_s17, %s740_s3 }
 0x3cf   :  { %p632_p9 = pnand %p630_p8, %p627_p7 }
 0x3d1   :  { %635 = shalt.err (!%p632_p9)
}
 0x3d2   :  { %484 = dma.vmem_to_hbm [thread:$0]  %s479_s13, 256, %s740_s3, [#allocation4], %s643_s22, %s643_s22, %s644_s23  }
 0x3d3   :  { %640 = dma.done.wait [#allocation4], 256  }
 0x3d4   :  { %641 = vsyncadd [#allocation4], 4294967040 }
 0x3d5   :  { %488 = vsyncpa [#allocation3], 1 }
 0x3d6   :  { %489 = vsyncpa [#allocation6], 1 }
 0x3d7   :  { %490 = vsyncpa [#allocation4], 1 }

</bundles_post_ra>
